<compile_context>
chip_gen: v5e
topology: v5e:2x2
jax: 0.10.0
libtpu: 0.0.40
codegen_flags: <defaults>
</compile_context>

<pallas_src>
import jax
import jax.numpy as jnp
from jax import lax
from jax.experimental import pallas as pl
from jax.experimental.pallas import tpu as pltpu

EPS = 1e-5


def conv_bn_add_kernel(w_ref, x_ref, r_ref, g_ref, b_ref, o_ref):
    # w_ref: (Cout, Cin)   1x1 conv weight
    # x_ref: (Cin, P)      flattened input pixels of x153 (channels on sublanes)
    # r_ref: (Cout, P)     residual (x146)
    # g_ref: (Cout, 1)     BN gamma
    # b_ref: (Cout, 1)     BN beta
    # o_ref: (Cout, P)     output
    # 1x1 conv == matmul over the channel dim (MXU), f32 accumulation.
    y = jnp.dot(w_ref[...], x_ref[...], preferred_element_type=jnp.float32)  # (Cout, P)

    # BatchNorm2d training mode: per-channel batch stats over (N,H,W) == P axis,
    # biased variance.  Two-pass (mean, then centered^2) for numerical safety.
    inv_p = 1.0 / y.shape[1]
    mean = jnp.sum(y, axis=1, keepdims=True) * inv_p                 # (Cout, 1)
    centered = y - mean                                              # reused below
    var = jnp.sum(centered * centered, axis=1, keepdims=True) * inv_p

    # Fold BN affine into a single per-channel scale on the centered slab:
    #   out = (y - mean) * (gamma * rsqrt(var + eps)) + beta + residual
    scale = g_ref[...] * lax.rsqrt(var + EPS)                        # (Cout, 1)
    o_ref[...] = (centered * scale + b_ref[...] + r_ref[...]).astype(o_ref.dtype)


def conv_bn_add(x153, x146, weight, gamma, beta):
    """x153: (N, 288, H, W), x146: (N, 96, H, W), weight: (96, 288, 1, 1)."""
    N, Cin, H, W = x153.shape
    Cout = weight.shape[0]
    P = N * H * W

    # NCHW -> (C, P) slabs.  For N=1 the transpose only moves a singleton axis,
    # so XLA lowers it to a bitcast/reshape (no data movement).
    x2d = jnp.transpose(x153.reshape(N, Cin, H * W), (1, 0, 2)).reshape(Cin, P)
    r2d = jnp.transpose(x146.reshape(N, Cout, H * W), (1, 0, 2)).reshape(Cout, P)
    w2d = weight.reshape(Cout, Cin)
    g2d = gamma.reshape(Cout, 1)
    b2d = beta.reshape(Cout, 1)

    cost = pl.CostEstimate(
        flops=2 * P * Cin * Cout,
        transcendentals=Cout,  # per-channel rsqrt
        bytes_accessed=4 * (Cin * P + Cout * Cin + 2 * Cout * P + 2 * Cout),
    )

    out2d = pl.pallas_call(
        conv_bn_add_kernel,
        out_shape=jax.ShapeDtypeStruct((Cout, P), x153.dtype),
        grid_spec=pltpu.PrefetchScalarGridSpec(
            num_scalar_prefetch=0,
            grid=(1,),
            in_specs=[
                pl.BlockSpec((Cout, Cin), lambda i: (0, 0)),
                pl.BlockSpec((Cin, P), lambda i: (0, 0)),
                pl.BlockSpec((Cout, P), lambda i: (0, 0)),
                pl.BlockSpec((Cout, 1), lambda i: (0, 0)),
                pl.BlockSpec((Cout, 1), lambda i: (0, 0)),
            ],
            out_specs=pl.BlockSpec((Cout, P), lambda i: (0, 0)),
        ),
        compiler_params=pltpu.CompilerParams(
            dimension_semantics=("arbitrary",),
        ),
        cost_estimate=cost,
    )(w2d, x2d, r2d, g2d, b2d)

    # (Cout, P) -> NCHW; for N=1 again a pure reshape.
    return jnp.transpose(out2d.reshape(Cout, N, H, W), (1, 0, 2, 3))


if __name__ == "__main__":
    key = jax.random.PRNGKey(0)
    k1, k2, k3, k4, k5 = jax.random.split(key, 5)

    N, Cin, Cout, H, W = 1, 288, 96, 14, 14

    x153 = jax.random.normal(k1, (N, Cin, H, W), dtype=jnp.float32)
    x146 = jax.random.normal(k2, (N, Cout, H, W), dtype=jnp.float32)

    # Conv2d(288, 96, 1x1, bias=False) weight, deterministic init
    weight = jax.random.normal(k3, (Cout, Cin, 1, 1), dtype=jnp.float32) * 0.05
    # BatchNorm2d(96) affine params (deterministic, non-trivial)
    gamma = 1.0 + 0.1 * jax.random.normal(k4, (Cout,), dtype=jnp.float32)
    beta = 0.1 * jax.random.normal(k5, (Cout,), dtype=jnp.float32)

    out = conv_bn_add(x153, x146, weight, gamma, beta)
    jax.block_until_ready(out)

    # Reference in plain JAX (training-mode BN with biased batch statistics).
    y = jnp.einsum("nchw,oc->nohw", x153, weight.reshape(Cout, Cin))
    mu = y.mean(axis=(0, 2, 3), keepdims=True)
    var = ((y - mu) ** 2).mean(axis=(0, 2, 3), keepdims=True)
    ref = (
        (y - mu) / jnp.sqrt(var + EPS) * gamma.reshape(1, Cout, 1, 1)
        + beta.reshape(1, Cout, 1, 1)
        + x146
    )
    assert out.shape == (N, Cout, H, W)
    assert jnp.allclose(out, ref, atol=1e-4, rtol=1e-4), "mismatch vs reference"

    print("KERNEL_OK")
</pallas_src>

<mosaic_0001>
module attributes {stable_mosaic.version = 11 : i64} {
  func.func @conv_bn_add_kernel(%arg0: i32, %arg1: memref<96x288xf32, #tpu.memory_space<vmem>>, %arg2: memref<288x196xf32, #tpu.memory_space<vmem>>, %arg3: memref<96x196xf32, #tpu.memory_space<vmem>>, %arg4: memref<96x1xf32, #tpu.memory_space<vmem>>, %arg5: memref<96x1xf32, #tpu.memory_space<vmem>>, %arg6: memref<96x196xf32, #tpu.memory_space<vmem>>) attributes {dimension_semantics = [#tpu.dimension_semantics<arbitrary>], iteration_bounds = array<i64: 1>, scalar_prefetch = 0 : i64, scratch_operands = 0 : i64, tpu.core_type = #tpu.core_type<tc>, window_params = [{pipeline_mode = #tpu.pipeline_mode<synchronous>, transform_indices = @transform_0, window_bounds = array<i64: 96, 288>}, {pipeline_mode = #tpu.pipeline_mode<synchronous>, transform_indices = @transform_1, window_bounds = array<i64: 288, 196>}, {pipeline_mode = #tpu.pipeline_mode<synchronous>, transform_indices = @transform_2, window_bounds = array<i64: 96, 196>}, {pipeline_mode = #tpu.pipeline_mode<synchronous>, transform_indices = @transform_3, window_bounds = array<i64: 96, 1>}, {pipeline_mode = #tpu.pipeline_mode<synchronous>, transform_indices = @transform_4, window_bounds = array<i64: 96, 1>}, {pipeline_mode = #tpu.pipeline_mode<synchronous>, transform_indices = @transform_5, window_bounds = array<i64: 96, 196>}]} {
    %c0 = arith.constant 0 : index
    %c0_0 = arith.constant 0 : index
    %0 = vector.load %arg1[%c0, %c0_0] : memref<96x288xf32, #tpu.memory_space<vmem>>, vector<96x288xf32>
    %c0_1 = arith.constant 0 : index
    %c0_2 = arith.constant 0 : index
    %1 = vector.load %arg2[%c0_1, %c0_2] : memref<288x196xf32, #tpu.memory_space<vmem>>, vector<288x196xf32>
    %cst = arith.constant dense<0.000000e+00> : vector<96x196xf32>
    %2 = tpu.matmul %0, %1, %cst {dimension_numbers = #tpu.dot_dimension_numbers<[1], [0], [0], [1], [0, 0, 1, 1], [], []>} : vector<96x288xf32>, vector<288x196xf32>, vector<96x196xf32> -> vector<96x196xf32>
    %cst_3 = arith.constant dense<0.000000e+00> : vector<96xf32>
    %3 = vector.multi_reduction <add>, %2, %cst_3 [1] : vector<96x196xf32> to vector<96xf32>
    %4 = vector.shape_cast %3 : vector<96xf32> to vector<96x1xf32>
    %cst_4 = arith.constant 0.00510204071 : f32
    %5 = vector.broadcast %cst_4 : f32 to vector<96x1xf32>
    %6 = arith.mulf %4, %5 : vector<96x1xf32>
    %7 = vector.broadcast %6 : vector<96x1xf32> to vector<96x196xf32>
    %8 = arith.subf %2, %7 : vector<96x196xf32>
    %9 = arith.mulf %8, %8 : vector<96x196xf32>
    %cst_5 = arith.constant dense<0.000000e+00> : vector<96xf32>
    %10 = vector.multi_reduction <add>, %9, %cst_5 [1] : vector<96x196xf32> to vector<96xf32>
    %11 = vector.shape_cast %10 : vector<96xf32> to vector<96x1xf32>
    %cst_6 = arith.constant 0.00510204071 : f32
    %12 = vector.broadcast %cst_6 : f32 to vector<96x1xf32>
    %13 = arith.mulf %11, %12 : vector<96x1xf32>
    %c0_7 = arith.constant 0 : index
    %c0_8 = arith.constant 0 : index
    %14 = vector.load %arg4[%c0_7, %c0_8] : memref<96x1xf32, #tpu.memory_space<vmem>>, vector<96x1xf32>
    %cst_9 = arith.constant 9.99999974E-6 : f32
    %15 = vector.broadcast %cst_9 : f32 to vector<96x1xf32>
    %16 = arith.addf %13, %15 : vector<96x1xf32>
    %17 = math.rsqrt %16 : vector<96x1xf32>
    %18 = arith.mulf %14, %17 : vector<96x1xf32>
    %19 = vector.broadcast %18 : vector<96x1xf32> to vector<96x196xf32>
    %20 = arith.mulf %8, %19 : vector<96x196xf32>
    %c0_10 = arith.constant 0 : index
    %c0_11 = arith.constant 0 : index
    %21 = vector.load %arg5[%c0_10, %c0_11] : memref<96x1xf32, #tpu.memory_space<vmem>>, vector<96x1xf32>
    %22 = vector.broadcast %21 : vector<96x1xf32> to vector<96x196xf32>
    %23 = arith.addf %20, %22 : vector<96x196xf32>
    %c0_12 = arith.constant 0 : index
    %c0_13 = arith.constant 0 : index
    %24 = vector.load %arg3[%c0_12, %c0_13] : memref<96x196xf32, #tpu.memory_space<vmem>>, vector<96x196xf32>
    %25 = arith.addf %23, %24 : vector<96x196xf32>
    %c0_14 = arith.constant 0 : index
    %c0_15 = arith.constant 0 : index
    %26 = vector.load %arg6[%c0_14, %c0_15] : memref<96x196xf32, #tpu.memory_space<vmem>>, vector<96x196xf32>
    tpu.vector_store %arg6[%c0_14, %c0_15], %25 {strides = array<i32>} : memref<96x196xf32, #tpu.memory_space<vmem>>, vector<96x196xf32>,
    return
  }
  func.func @transform_0(%arg0: i32) -> (i32, i32) {
    %c0_i32 = arith.constant 0 : i32
    %c0_i32_0 = arith.constant 0 : i32
    %c0_i32_1 = arith.constant 0 : i32
    return %c0_i32, %c0_i32_0 : i32, i32
  }
  func.func @transform_1(%arg0: i32) -> (i32, i32) {
    %c0_i32 = arith.constant 0 : i32
    %c0_i32_0 = arith.constant 0 : i32
    %c0_i32_1 = arith.constant 0 : i32
    return %c0_i32, %c0_i32_0 : i32, i32
  }
  func.func @transform_2(%arg0: i32) -> (i32, i32) {
    %c0_i32 = arith.constant 0 : i32
    %c0_i32_0 = arith.constant 0 : i32
    %c0_i32_1 = arith.constant 0 : i32
    return %c0_i32, %c0_i32_0 : i32, i32
  }
  func.func @transform_3(%arg0: i32) -> (i32, i32) {
    %c0_i32 = arith.constant 0 : i32
    %c0_i32_0 = arith.constant 0 : i32
    %c0_i32_1 = arith.constant 0 : i32
    return %c0_i32, %c0_i32_0 : i32, i32
  }
  func.func @transform_4(%arg0: i32) -> (i32, i32) {
    %c0_i32 = arith.constant 0 : i32
    %c0_i32_0 = arith.constant 0 : i32
    %c0_i32_1 = arith.constant 0 : i32
    return %c0_i32, %c0_i32_0 : i32, i32
  }
  func.func @transform_5(%arg0: i32) -> (i32, i32) {
    %c0_i32 = arith.constant 0 : i32
    %c0_i32_0 = arith.constant 0 : i32
    %c0_i32_1 = arith.constant 0 : i32
    return %c0_i32, %c0_i32_0 : i32, i32
  }
}

</mosaic_0001>

<bundles_post_ra>
// kernel: tpu_custom_call.1
= control target key start
LH: loop header
LB: loop body
LE: loop exit
PB: predicated region body
PF: predicated region fallthrough
CT: control target
= control target key end

     0   :  { %10 = vsyncpa [#allocation3], 0  ;;  %s1933_s0 = inlined_call_operand.hbm [shape: f32[96,288], index: 0, kind: input, shape index: {}]   ;;  %s1934_s1 = inlined_call_operand.hbm [shape: f32[288,196], index: 1, kind: input, shape index: {}]   ;;  %s1935_s2 = inlined_call_operand.vmem [shape: f32[96,196], index: 2, kind: input, shape index: {}]   ;;  %s1936_s3 = inlined_call_operand.vmem [shape: f32[96,1], index: 3, kind: input, shape index: {}]   ;;  %s1937_s4 = inlined_call_operand.vmem [shape: f32[96,1], index: 4, kind: input, shape index: {}]   ;;  %s1938_s5 = inlined_call_operand.hbm [shape: f32[96,196], index: 5, kind: output, shape index: {}]  }
   0x1   :  { %11 = vsyncpa [#allocation6], 0 }
   0x2   :  { %12 = vsyncpa [#allocation4], 0  ;;  %s17_s20 = sshll.u32 %s1933_s0, 4  ;;  %s1274_s21 = smov [#allocation2]   ;;  %s18_s20 = int_to_ptr.hbm [resolvable:$true] %s17_s20 }
   0x3   :  { %s19_s22 = sshll.u32 %s1274_s21, 4  ;;  %s30_s25 = sshll.u32 %s1934_s1, 4  ;;  %s20_s22 = int_to_ptr.vmem [resolvable:$true] %s19_s22  ;;  %s31_s25 = int_to_ptr.hbm [resolvable:$true] %s30_s25 }
   0x4   :  { %s1275_s26 = smov 384   ;;  %s1276_s27 = smov 24  }
   0x5   :  { %25 = dma.hbm_to_vmem [thread:$0]  %s18_s20, 4608, %s20_s22, [#allocation3], %s1275_s26, %s1275_s26, %s1276_s27  }
   0x6   :  { %s1277_s28 = smov [#allocation5]   ;;  %s1278_s30 = smov 256  }
   0x7   :  { %s32_s29 = sshll.u32 %s1277_s28, 4  ;;  %s1279_s6 = smov 16   ;;  %s33_s29 = int_to_ptr.vmem [resolvable:$true] %s32_s29 }
   0x8   :  { %38 = dma.hbm_to_vmem [thread:$0]  %s31_s25, 9216, %s33_s29, [#allocation6], %s1278_s30, %s1278_s30, %s1279_s6  }
   0x9   :  { %1268 = dma.done.wait [#allocation3], 4608  }
   0xa   :  { %1269 = vsyncadd [#allocation3], 4294962688 }
   0xb   :  { %1270 = dma.done.wait [#allocation6], 9216  }
   0xc   :  { %1271 = vsyncadd [#allocation6], 4294958080  ;;  %v119_v0 = vld [vmem:[#allocation5 + $0xf0] sm:$0xff]  ;;  %v117_v2 = vld [vmem:[#allocation5 + $0xe0] sm:$0xff]  ;;  %vm161_vm0 = vcmask 261120   ;;  %vm516_vm1 = vcmask 556032  }
   0xd   :  { %v159_v1 = vld [vmem:[#allocation5 + $0x230] sm:$0xff]  ;;  %1137 = vmatpush.msra.mxu1 %v119_v0  ;;  %198 = vmatpush.msra.mxu0 %v119_v0  ;;  %v157_v3 = vld [vmem:[#allocation5 + $0x220] sm:$0xff]  ;;  %v120_v10 = vld [vmem:[#allocation5 + $0xf8] sm:$0xff]  ;;  %s1281_s22 = smov [#allocation7]   ;;  %s1099_s26 = sshll.u32 %s1938_s5, 4  ;;  %s1100_s26 = int_to_ptr.hbm [resolvable:$true] %s1099_s26 }
   0xe   :  { %1153 = vmatpush.msra.mxu3 %v159_v1  ;;  %v115_v4 = vld [vmem:[#allocation5 + $0xd0] sm:$0xff]  ;;  %316 = vmatpush.msra.mxu2 %v159_v1  ;;  %v113_v6 = vld [vmem:[#allocation5 + $0xc0] sm:$0xff]  ;;  %v118_v12 = vld [vmem:[#allocation5 + $0xe8] sm:$0xff]  ;;  %s1097_s23 = sshll.u32 %s1281_s22, 4  ;;  %s1098_s23 = int_to_ptr.vmem [resolvable:$true] %s1097_s23 }
   0xf   :  { %1138 = vmatpush.msra.mxu1 %v117_v2  ;;  %199 = vmatpush.msra.mxu0 %v117_v2  ;;  %v155_v5 = vld [vmem:[#allocation5 + $0x210] sm:$0xff]  ;;  %v153_v7 = vld [vmem:[#allocation5 + $0x200] sm:$0xff]  ;;  %v116_v14 = vld [vmem:[#allocation5 + $0xd8] sm:$0xff] }
  0x10   :  { %1154 = vmatpush.msra.mxu3 %v157_v3  ;;  %317 = vmatpush.msra.mxu2 %v157_v3  ;;  %v111_v8 = vld [vmem:[#allocation5 + $0xb0] sm:$0xff]  ;;  %v109_v11 = vld [vmem:[#allocation5 + $0xa0] sm:$0xff]  ;;  %v152_v17 = vld [vmem:[#allocation5 + $0x1f8] sm:$0xff] }
  0x11   :  { %1139 = vmatpush.msra.mxu1 %v115_v4  ;;  %200 = vmatpush.msra.mxu0 %v115_v4  ;;  %v1321_v9 = vld [vmem:[#allocation2 + $0x70] sm:$0xff]  ;;  %v105_v15 = vld [vmem:[#allocation5 + $0x80] sm:$0xff]  ;;  %v114_v18 = vld [vmem:[#allocation5 + $0xc8] sm:$0xff] }
  0x12   :  { %1155 = vmatpush.msra.mxu3 %v155_v5  ;;  %318 = vmatpush.msra.mxu2 %v155_v5  ;;  %v107_v13 = vld [vmem:[#allocation5 + $0x90] sm:$0xff]  ;;  %v1329_v20 = vld [vmem:[#allocation2 + $0x88] sm:$0xff]  ;;  %v112_v21 = vld [vmem:[#allocation5 + $0xb8] sm:$0xff] }
  0x13   :  { %1140 = vmatpush.msra.mxu1 %v113_v6  ;;  %201 = vmatpush.msra.mxu0 %v113_v6  ;;  %v1325_v16 = vld [vmem:[#allocation2 + $0x10] sm:$0xff]  ;;  %v101_v22 = vld [vmem:[#allocation5 + $0x60] sm:$0xff]  ;;  %v150_v23 = vld [vmem:[#allocation5 + $0x1e8] sm:$0xff] }
  0x14   :  { %1156 = vmatpush.msra.mxu3 %v153_v7  ;;  %319 = vmatpush.msra.mxu2 %v153_v7  ;;  %v103_v19 = vld [vmem:[#allocation5 + $0x70] sm:$0xff]  ;;  %v110_v24 = vld [vmem:[#allocation5 + $0xa8] sm:$0xff]  ;;  %v148_v26 = vld [vmem:[#allocation5 + $0x1d8] sm:$0xff] }
  0x15   :  { %1141 = vmatpush.msra.mxu1 %v111_v8  ;;  %1117 = vmatmul.msk.f32.vlgmr.msra.gmra.mxu3 %vm161_vm0, %v1321_v9  ;;  %v99_v25 = vld [vmem:[#allocation5 + $0x50] sm:$0xff]  ;;  %v108_v27 = vld [vmem:[#allocation5 + $0x98] sm:$0xff]  ;;  %v97_v28 = vld [vmem:[#allocation5 + $0x40] sm:$0xff] }
  0x16   :  { %357 = vmatpush.msrb.mxu3 %v120_v10  ;;  %202 = vmatpush.msra.mxu0 %v111_v8  ;;  %v146_v29 = vld [vmem:[#allocation5 + $0x1c8] sm:$0xff]  ;;  %v95_v31 = vld [vmem:[#allocation5 + $0x30] sm:$0xff]  ;;  %v1333_v32 = vld [vmem:[#allocation2 + $0xa0] sm:$0xff] }
  0x17   :  { %1142 = vmatpush.msra.mxu1 %v109_v11  ;;  %1113 = vmatmul.msk.f32.vlgmr.msra.gmra.mxu2 %vm161_vm0, %v1325_v16  ;;  %v106_v30 = vld [vmem:[#allocation5 + $0x88] sm:$0xff]  ;;  %v104_v33 = vld [vmem:[#allocation5 + $0x78] sm:$0xff]  ;;  %v93_v34 = vld [vmem:[#allocation5 + $0x20] sm:$0xff] }
  0x18   :  { %203 = vmatpush.msra.mxu0 %v109_v11  ;;  %358 = vmatpush.msrb.mxu3 %v118_v12  ;;  %v1335_v35 = vld [vmem:[#allocation2 + $0x28] sm:$0xff]  ;;  %v144_v36 = vld [vmem:[#allocation5 + $0x1b8] sm:$0xff]  ;;  %v91_v37 = vld [vmem:[#allocation5 + $0x10] sm:$0xff] }
  0x19   :  { %1143 = vmatpush.msra.mxu1 %v107_v13  ;;  %410 = vmatpush.msrb.mxu2 %v152_v17  ;;  %v102_v38 = vld [vmem:[#allocation5 + $0x68] sm:$0xff]  ;;  %v89_v40 = vld [vmem:[#allocation5] sm:$0xff]  ;;  %v100_v41 = vld [vmem:[#allocation5 + $0x58] sm:$0xff] }
  0x1a   :  { %204 = vmatpush.msra.mxu0 %v107_v13  ;;  %359 = vmatpush.msrb.mxu3 %v116_v14  ;;  %v142_v39 = vld [vmem:[#allocation5 + $0x1a8] sm:$0xff]  ;;  %v1341_v42 = vld [vmem:[#allocation2 + $0x90] sm:$0xff]  ;;  %v1343_v44 = vld [vmem:[#allocation2] sm:$0xff] }
  0x1b   :  { %1144 = vmatpush.msra.mxu1 %v105_v15  ;;  %411 = vmatpush.msrb.mxu2 %v150_v23  ;;  %v151_v43 = vld [vmem:[#allocation5 + $0x1f0] sm:$0xff]  ;;  %v1345_v45 = vld [vmem:[#allocation2 + $0xb8] sm:$0xff]  ;;  %v149_v47 = vld [vmem:[#allocation5 + $0x1e0] sm:$0xff] }
  0x1c   :  { %205 = vmatpush.msra.mxu0 %v105_v15  ;;  %360 = vmatpush.msrb.mxu3 %v114_v18  ;;  %v1347_v46 = vld [vmem:[#allocation5 + $0x238] sm:$0xff]  ;;  %v1351_v49 = vld [vmem:[#allocation5 + $0x228] sm:$0xff]  ;;  %v1353_v50 = vld [vmem:[#allocation2 + $0x40] sm:$0xff] }
  0x1d   :  { %1145 = vmatpush.msra.mxu1 %v103_v19  ;;  %1118 = vmatmul.msk.f32.gmra.mxu3 %vm161_vm0, %v1329_v20  ;;  %v140_v48 = vld [vmem:[#allocation5 + $0x198] sm:$0xff]  ;;  %v147_v51 = vld [vmem:[#allocation5 + $0x1d0] sm:$0xff]  ;;  %v138_v52 = vld [vmem:[#allocation5 + $0x188] sm:$0xff] }
  0x1e   :  { %206 = vmatpush.msra.mxu0 %v103_v19  ;;  %361 = vmatpush.msrb.mxu3 %v112_v21  ;;  %v98_v53 = vld [vmem:[#allocation5 + $0x48] sm:$0xff]  ;;  %v1358_v54 = vld [vmem:[#allocation5 + $0x218] sm:$0xff]  ;;  %v145_v55 = vld [vmem:[#allocation5 + $0x1c0] sm:$0xff] }
  0x1f   :  { %1146 = vmatpush.msra.mxu1 %v101_v22  ;;  %412 = vmatpush.msrb.mxu2 %v148_v26  ;;  %v136_v56 = vld [vmem:[#allocation5 + $0x178] sm:$0xff]  ;;  %v1363_v57 = vld [vmem:[#allocation2 + $0xa8] sm:$0xff]  ;;  %v143_v60 = vld [vmem:[#allocation5 + $0x1b0] sm:$0xff] }
  0x20   :  { %207 = vmatpush.msra.mxu0 %v101_v22  ;;  %362 = vmatpush.msrb.mxu3 %v110_v24  ;;  %v96_v58 = vld [vmem:[#allocation5 + $0x38] sm:$0xff]  ;;  %v1368_v61 = vld [vmem:[#allocation2 + $0xd0] sm:$0xff]  ;;  %v134_v62 = vld [vmem:[#allocation5 + $0x168] sm:$0xff] }
  0x21   :  { %1147 = vmatpush.msra.mxu1 %v99_v25  ;;  %413 = vmatpush.msrb.mxu2 %v146_v29  ;;  %v1365_v59 = vld [vmem:[#allocation2 + $0x18] sm:$0xff]  ;;  %v141_v63 = vld [vmem:[#allocation5 + $0x1a0] sm:$0xff]  ;;  %v94_v0 = vld [vmem:[#allocation5 + $0x28] sm:$0xff] }
  0x22   :  { %208 = vmatpush.msra.mxu0 %v99_v25  ;;  %363 = vmatpush.msrb.mxu3 %v108_v27  ;;  %v132_v1 = vld [vmem:[#allocation5 + $0x158] sm:$0xff]  ;;  %v154_v2 = vld [vmem:[#allocation5 + $0x208] sm:$0xff]  ;;  %v139_v3 = vld [vmem:[#allocation5 + $0x190] sm:$0xff] }
  0x23   :  { %1148 = vmatpush.msra.mxu1 %v97_v28  ;;  %1114 = vmatmul.msk.f32.gmra.mxu2 %vm161_vm0, %v1335_v35  ;;  %v1374_v4 = vld [vmem:[#allocation2 + $0x58] sm:$0xff]  ;;  %v130_v5 = vld [vmem:[#allocation5 + $0x148] sm:$0xff]  ;;  %v137_v7 = vld [vmem:[#allocation5 + $0x180] sm:$0xff] }
  0x24   :  { %209 = vmatpush.msra.mxu0 %v97_v28  ;;  %364 = vmatpush.msrb.mxu3 %v106_v30  ;;  %v92_v6 = vld [vmem:[#allocation5 + $0x18] sm:$0xff]  ;;  %v1376_v8 = vld [vmem:[#allocation2 + $0xc0] sm:$0xff]  ;;  %v1380_v11 = vld [vmem:[#allocation2 + $0x30] sm:$0xff] }
  0x25   :  { %1149 = vmatpush.msra.mxu1 %v95_v31  ;;  %1119 = vmatmul.msk.f32.gmra.mxu3 %vm161_vm0, %v1333_v32  ;;  %v128_v10 = vld [vmem:[#allocation5 + $0x138] sm:$0xff]  ;;  %v135_v12 = vld [vmem:[#allocation5 + $0x170] sm:$0xff]  ;;  %v1382_v13 = vld [vmem:[#allocation2 + $0xe8] sm:$0xff] }
  0x26   :  { %210 = vmatpush.msra.mxu0 %v95_v31  ;;  %365 = vmatpush.msrb.mxu3 %v104_v33  ;;  %v126_v14 = vld [vmem:[#allocation5 + $0x128] sm:$0xff]  ;;  %v133_v15 = vld [vmem:[#allocation5 + $0x160] sm:$0xff]  ;;  %v124_v18 = vld [vmem:[#allocation5 + $0x118] sm:$0xff] }
  0x27   :  { %1150 = vmatpush.msra.mxu1 %v93_v34  ;;  %414 = vmatpush.msrb.mxu2 %v144_v36  ;;  %v90_v17 = vld [vmem:[#allocation5 + $0x8] sm:$0xff]  ;;  %v131_v19 = vld [vmem:[#allocation5 + $0x150] sm:$0xff]  ;;  %v129_v22 = vld [vmem:[#allocation5 + $0x140] sm:$0xff] }
  0x28   :  { %211 = vmatpush.msra.mxu0 %v93_v34  ;;  %366 = vmatpush.msrb.mxu3 %v102_v38  ;;  %v122_v21 = vld [vmem:[#allocation5 + $0x108] sm:$0xff]  ;;  %v1388_v24 = vld [vmem:[#allocation2 + $0xd8] sm:$0xff]  ;;  %v127_v26 = vld [vmem:[#allocation5 + $0x130] sm:$0xff] }
  0x29   :  { %1151 = vmatpush.msra.mxu1 %v91_v37  ;;  %415 = vmatpush.msrb.mxu2 %v142_v39  ;;  %v54_v23 = vld [vmem:[#allocation2 + $0x8] sm:$0xff]  ;;  %v1390_v27 = vld [vmem:[#allocation2 + $0x100] sm:$0xff]  ;;  %v123_v29 = vld [vmem:[#allocation5 + $0x110] sm:$0xff] }
  0x2a   :  { %212 = vmatpush.msra.mxu0 %v91_v37  ;;  %367 = vmatpush.msrb.mxu3 %v100_v41  ;;  %v62_v25 = vld [vmem:[#allocation2 + $0x48] sm:$0xff]  ;;  %v125_v28 = vld [vmem:[#allocation5 + $0x120] sm:$0xff]  ;;  %v1398_v33 = vld [vmem:[#allocation2 + $0xf0] sm:$0xff] }
  0x2b   :  { %1152 = vmatpush.msra.mxu1 %v89_v40  ;;  %416 = vmatpush.msrb.mxu2 %v140_v48  ;;  %v57_v30 = vld [vmem:[#allocation2 + $0x20] sm:$0xff]  ;;  %v1400_v36 = vld [vmem:[#allocation2 + $0x118] sm:$0xff]  ;;  %v1405_v38 = vld [vmem:[#allocation2 + $0x108] sm:$0xff] }
  0x2c   :  { %213 = vmatpush.msra.mxu0 %v89_v40  ;;  %232 = vmatmul.f32.vlgmr.msra.gmra.mxu1 %v1341_v42  ;;  %v121_v31 = vld [vmem:[#allocation5 + $0x100] sm:$0xff]  ;;  %v60_v37 = vld [vmem:[#allocation2 + $0x38] sm:$0xff]  ;;  %v63_v40 = vld [vmem:[#allocation2 + $0x50] sm:$0xff] }
  0x2d   :  { %251 = vmatpush.msrb.mxu1 %v151_v43  ;;  %214 = vmatmul.f32.vlgmr.msra.gmra.mxu0 %v1343_v44  ;;  %v65_v34 = vld [vmem:[#allocation2 + $0x60] sm:$0xff]  ;;  %v68_v39 = vld [vmem:[#allocation2 + $0x78] sm:$0xff]  ;;  %v66_v41 = vld [vmem:[#allocation2 + $0x68] sm:$0xff] }
  0x2e   :  { %1120 = vmatmul.msk.f32.gmra.mxu3 %vm161_vm0, %v1345_v45  ;;  %475 = vmatpush.msrb.mxu0 %v1347_v46  ;;  %v69_v43 = vld [vmem:[#allocation2 + $0x80] sm:$0xff]  ;;  %v87_v48 = vld [vmem:[#allocation2 + $0x110] sm:$0xff] }
  0x2f   :  { %252 = vmatpush.msrb.mxu1 %v149_v47  ;;  %1115 = vmatmul.msk.f32.gmra.mxu2 %vm161_vm0, %v1353_v50  ;;  %v1280_v47 = vmov 0  }
  0x30   :  { %476 = vmatpush.msrb.mxu0 %v1351_v49  ;;  %417 = vmatpush.msrb.mxu2 %v138_v52 }
  0x31   :  { %253 = vmatpush.msrb.mxu1 %v147_v51  ;;  %368 = vmatpush.msrb.mxu3 %v98_v53  ;;  %v928_v51 = vld [vmem:[%s1937_s4 + $0x18] sm:$0xff] }
  0x32   :  { %477 = vmatpush.msrb.mxu0 %v1358_v54  ;;  %418 = vmatpush.msrb.mxu2 %v136_v56  ;;  %v927_v56 = vld [vmem:[%s1937_s4 + $0x10] sm:$0xff] }
  0x33   :  { %254 = vmatpush.msrb.mxu1 %v145_v55  ;;  %369 = vmatpush.msrb.mxu3 %v96_v58 }
  0x34   :  { %235 = vmatmul.f32.gmra.mxu1 %v1363_v57  ;;  %419 = vmatpush.msrb.mxu2 %v134_v62 }
  0x35   :  { %217 = vmatmul.f32.gmra.mxu0 %v1365_v59  ;;  %255 = vmatpush.msrb.mxu1 %v143_v60  ;;  %v930_v60 = vld [vmem:[%s1937_s4 + $0x28] sm:$0xff] }
  0x36   :  { %1121 = vmatmul.msk.f32.gmra.mxu3 %vm161_vm0, %v1368_v61  ;;  %420 = vmatpush.msrb.mxu2 %v132_v1 }
  0x37   :  { %256 = vmatpush.msrb.mxu1 %v141_v63  ;;  %370 = vmatpush.msrb.mxu3 %v94_v0 }
  0x38   :  { %478 = vmatpush.msrb.mxu0 %v154_v2  ;;  %1116 = vmatmul.msk.f32.gmra.mxu2 %vm161_vm0, %v1374_v4 }
  0x39   :  { %257 = vmatpush.msrb.mxu1 %v139_v3  ;;  %421 = vmatpush.msrb.mxu2 %v130_v5 }
  0x3a   :  { %371 = vmatpush.msrb.mxu3 %v92_v6  ;;  %1170 = vset.pattern.permute.xlu0 %v1280_v47 }
  0x3b   :  { %258 = vmatpush.msrb.mxu1 %v137_v7  ;;  %422 = vmatpush.msrb.mxu2 %v128_v10 }
  0x3c   :  { %238 = vmatmul.f32.gmra.mxu1 %v1376_v8  ;;  %372 = vmatpush.msrb.mxu3 %v90_v17 }
  0x3d   :  { %220 = vmatmul.f32.gmra.mxu0 %v1380_v11  ;;  %259 = vmatpush.msrb.mxu1 %v135_v12 }
  0x3e   :  { %1122 = vmatmul.msk.f32.gmra.mxu3 %vm161_vm0, %v1382_v13  ;;  %423 = vmatpush.msrb.mxu2 %v126_v14 }
  0x3f   :  { %260 = vmatpush.msrb.mxu1 %v133_v15  ;;  %1169 = vset.pattern.permute.xlu1 %v1280_v47 }
  0x40   :  { %424 = vmatpush.msrb.mxu2 %v124_v18  ;;  %1171 = vset.pattern.permute.xlu2 %v1280_v47 }
  0x41   :  { %261 = vmatpush.msrb.mxu1 %v131_v19  ;;  %949 = vperm.xlu2 %1171, %v927_v56  }
  0x42   :  { %425 = vmatpush.msrb.mxu2 %v122_v21 }
  0x43   :  { %262 = vmatpush.msrb.mxu1 %v129_v22  ;;  %426 = vmatmul.f32.vlgmr.msrb.gmra.mxu2 %v54_v23 }
  0x44   :  { %241 = vmatmul.f32.gmra.mxu1 %v1388_v24  ;;  %1157 = vmatpush.msra.mxu2 %v1347_v46  ;;  %v81_v46 = vld [vmem:[#allocation2 + $0xe0] sm:$0xff] }
  0x45   :  { %223 = vmatmul.f32.gmra.mxu0 %v62_v25  ;;  %263 = vmatpush.msrb.mxu1 %v127_v26 }
  0x46   :  { %1123 = vmatmul.msk.f32.gmra.mxu3 %vm161_vm0, %v1390_v27  ;;  %1158 = vmatpush.msra.mxu2 %v1351_v49  ;;  %v925_v49 = vld [vmem:[%s1937_s4] sm:$0xff] }
  0x47   :  { %264 = vmatpush.msrb.mxu1 %v125_v28  ;;  %939 = vperm.xlu1 %1169, %v925_v49  }
  0x48   :  { %1159 = vmatpush.msra.mxu2 %v1358_v54 }
  0x49   :  { %265 = vmatpush.msrb.mxu1 %v123_v29  ;;  %964 = vperm.xlu2 %1171, %v930_v60  }
  0x4a   :  { %1160 = vmatpush.msra.mxu2 %v154_v2 }
  0x4b   :  { %429 = vmatmul.f32.gmra.mxu2 %v57_v30  ;;  %266 = vmatpush.msrb.mxu1 %v121_v31 }
  0x4c   :  { %244 = vmatmul.f32.gmra.mxu1 %v1398_v33 }
  0x4d   :  { %226 = vmatmul.f32.gmra.mxu0 %v65_v34 }
  0x4e   :  { %1124 = vmatmul.msk.f32.gmra.mxu3 %vm161_vm0, %v1400_v36 }
  0x4f   :  { %954 = vperm.xlu1 %1169, %v928_v51  }
  0x53   :  { %432 = vmatmul.f32.gmra.mxu2 %v60_v37 }
  0x54   :  { %247 = vmatmul.f32.gmra.mxu1 %v1405_v38 }
  0x55   :  { %229 = vmatmul.f32.gmra.mxu0 %v68_v39 }
  0x56   :  { %373 = vmatmul.f32.vlgmr.msrb.gmra.mxu3 %v1343_v44  ;;  %v72_v44 = vld [vmem:[#allocation2 + $0x98] sm:$0xff] }
  0x5b   :  { %435 = vmatmul.f32.gmra.mxu2 %v63_v40 }
  0x5c   :  { %267 = vmatmul.f32.vlgmr.msrb.gmra.mxu1 %v54_v23 }
  0x5d   :  { %1125 = vmatmul.msk.f32.vlgmr.msrb.gmra.mxu0 %vm161_vm0, %v1325_v16  ;;  %v75_v16 = vld [vmem:[#allocation2 + $0xb0] sm:$0xff] }
  0x5e   :  { %376 = vmatmul.f32.gmra.mxu3 %v1365_v59 }
  0x63   :  { %438 = vmatmul.f32.gmra.mxu2 %v66_v41 }
  0x64   :  { %270 = vmatmul.f32.gmra.mxu1 %v57_v30 }
  0x65   :  { %1126 = vmatmul.msk.f32.gmra.mxu0 %vm161_vm0, %v1335_v35  ;;  %v78_v35 = vld [vmem:[#allocation2 + $0xc8] sm:$0xff] }
  0x66   :  { %379 = vmatmul.f32.gmra.mxu3 %v1380_v11 }
  0x6b   :  { %441 = vmatmul.f32.gmra.mxu2 %v69_v43 }
  0x6c   :  { %273 = vmatmul.f32.gmra.mxu1 %v60_v37 }
  0x6d   :  { %1127 = vmatmul.msk.f32.gmra.mxu0 %vm161_vm0, %v1353_v50 }
  0x6e   :  { %382 = vmatmul.f32.gmra.mxu3 %v62_v25 }
  0x73   :  { %444 = vmatmul.f32.gmra.mxu2 %v72_v44 }
  0x74   :  { %276 = vmatmul.f32.gmra.mxu1 %v63_v40 }
  0x75   :  { %1128 = vmatmul.msk.f32.gmra.mxu0 %vm161_vm0, %v1374_v4 }
  0x76   :  { %385 = vmatmul.f32.gmra.mxu3 %v65_v34 }
  0x7b   :  { %447 = vmatmul.f32.gmra.mxu2 %v75_v16 }
  0x7c   :  { %279 = vmatmul.f32.gmra.mxu1 %v66_v41 }
  0x7d   :  { %1129 = vmatmul.msk.f32.gmra.mxu0 %vm161_vm0, %v1321_v9  ;;  %v926_v9 = vld [vmem:[%s1937_s4 + $0x8] sm:$0xff] }
  0x7e   :  { %388 = vmatmul.f32.gmra.mxu3 %v68_v39  ;;  %944 = vperm.xlu0 %1170, %v926_v9  }
  0x83   :  { %450 = vmatmul.f32.gmra.mxu2 %v78_v35 }
  0x84   :  { %282 = vmatmul.f32.gmra.mxu1 %v69_v43 }
  0x85   :  { %1130 = vmatmul.msk.f32.gmra.mxu0 %vm161_vm0, %v1329_v20  ;;  %v84_v20 = vld [vmem:[#allocation2 + $0xf8] sm:$0xff] }
  0x86   :  { %391 = vmatmul.f32.gmra.mxu3 %v1341_v42  ;;  %v929_v42 = vld [vmem:[%s1937_s4 + $0x20] sm:$0xff] }
  0x87   :  { %959 = vperm.xlu0 %1170, %v929_v42  }
  0x8b   :  { %453 = vmatmul.f32.gmra.mxu2 %v81_v46 }
  0x8c   :  { %285 = vmatmul.f32.gmra.mxu1 %v72_v44 }
  0x8d   :  { %1131 = vmatmul.msk.f32.gmra.mxu0 %vm161_vm0, %v1333_v32 }
  0x8e   :  { %394 = vmatmul.f32.gmra.mxu3 %v1363_v57 }
  0x93   :  { %456 = vmatmul.f32.gmra.mxu2 %v84_v20 }
  0x94   :  { %288 = vmatmul.f32.gmra.mxu1 %v75_v16 }
  0x95   :  { %1132 = vmatmul.msk.f32.gmra.mxu0 %vm161_vm0, %v1345_v45 }
  0x96   :  { %397 = vmatmul.f32.gmra.mxu3 %v1376_v8 }
  0x98   :  { %v1436_v32 = vpop.f32.mrf.mxu3 }
  0x9a   :  { %v321_v45 = vpop.f32.mrf.mxu2 }
  0x9b   :  { %459 = vmatmul.f32.gmra.mxu2 %v87_v48 }
  0x9c   :  { %291 = vmatmul.f32.gmra.mxu1 %v78_v35 }
  0x9d   :  { %1133 = vmatmul.msk.f32.gmra.mxu0 %vm161_vm0, %v1368_v61 }
  0x9e   :  { %400 = vmatmul.f32.gmra.mxu3 %v1388_v24 }
  0xa0   :  { %v1444_v50 = vpop.f32.mrf.mxu3 }
  0xa3   :  { %1136 = vmatmul.msk.f32.vlgmr.msra.gmra.mxu2 %vm161_vm0, %v1400_v36 }
  0xa4   :  { %294 = vmatmul.f32.gmra.mxu1 %v81_v46 }
  0xa5   :  { %1134 = vmatmul.msk.f32.gmra.mxu0 %vm161_vm0, %v1382_v13 }
  0xa6   :  { %403 = vmatmul.f32.gmra.mxu3 %v1398_v33  ;;  %v324_v55 = vpop.f32.mrf.mxu2 }
  0xa8   :  { %v1454_v52 = vpop.f32.mrf.mxu3 }
  0xa9   :  { %v1456_v53 = vpop.f32.mrf.mxu1 }
  0xaa   :  { %v215_v54 = vpop.f32.mrf.mxu0 }
  0xac   :  { %297 = vmatmul.f32.gmra.mxu1 %v84_v20 }
  0xad   :  { %1135 = vmatmul.msk.f32.gmra.mxu0 %vm161_vm0, %v1390_v27 }
  0xae   :  { %406 = vmatmul.f32.gmra.mxu3 %v1405_v38 }
  0xb1   :  { %v1464_v57 = vpop.f32.mrf.mxu3  ;;  %v1466_v58 = vpop.f32.mrf.mxu1 }
  0xb2   :  { %v218_v59 = vpop.f32.mrf.mxu0  ;;  %v327_v61 = vpop.f32.mrf.mxu2 }
  0xb4   :  { %300 = vmatmul.f32.gmra.mxu1 %v87_v48 }
  0xb9   :  { %v1471_v62 = vpop.f32.mrf.mxu3  ;;  %v1473_v63 = vpop.f32.mrf.mxu1 }
  0xba   :  { %v221_v0 = vpop.f32.mrf.mxu0 }
  0xbb   :  { %v330_v1 = vpop.f32.mrf.mxu2 }
  0xc1   :  { %v1475_v2 = vpop.f32.mrf.mxu3  ;;  %v1477_v3 = vpop.f32.mrf.mxu1 }
  0xc2   :  { %v224_v4 = vpop.f32.mrf.mxu0 }
  0xc6   :  { %v427_v5 = vpop.f32.mrf.mxu2 }
  0xc9   :  { %v1479_v6 = vpop.f32.mrf.mxu3  ;;  %v1481_v7 = vpop.f32.mrf.mxu1 }
  0xca   :  { %v227_v8 = vpop.f32.mrf.mxu0 }
  0xce   :  { %v430_v10 = vpop.f32.mrf.mxu2 }
  0xd1   :  { %v1483_v11 = vpop.f32.mrf.mxu3  ;;  %v1485_v12 = vpop.f32.mrf.mxu1 }
  0xd2   :  { %v230_v13 = vpop.f32.mrf.mxu0 }
  0xd6   :  { %v433_v14 = vpop.f32.mrf.mxu2 }
  0xd9   :  { %v374_v15 = vpop.f32.mrf.mxu3  ;;  %v268_v17 = vpop.f32.mrf.mxu1 }
  0xda   :  { %v428_v18 = vadd.f32 %v427_v5, %v374_v15  ;;  %v269_v19 = vadd.f32 %v268_v17, %v215_v54  ;;  %v480_v21 = vpop.f32.mrf.mxu0 }
  0xdc   :  { %v1487_v22 = vadd.f32 %v321_v45, %v269_v19  ;;  %v1489_v23 = vadd.f32 %v480_v21, %v428_v18 }
  0xde   :  { %v517_v24 = vsel %vm516_vm1, %v1489_v23, 0.0  ;;  %v436_v25 = vpop.f32.mrf.mxu2 }
  0xdf   :  { %v518_v26 = vadd.f32 %v517_v24, %v1487_v22 }
  0xe1   :  { %v377_v27 = vpop.f32.mrf.mxu3  ;;  %519 = vadd.xlane.f32.xlu0 %v518_v26  ;;  %v271_v28 = vpop.f32.mrf.mxu1 }
  0xe2   :  { %v431_v29 = vadd.f32 %v430_v10, %v377_v27  ;;  %v272_v30 = vadd.f32 %v271_v28, %v218_v59  ;;  %v483_v31 = vpop.f32.mrf.mxu0 }
  0xe4   :  { %v1494_v33 = vadd.f32 %v324_v55, %v272_v30  ;;  %v1496_v34 = vadd.f32 %v483_v31, %v431_v29 }
  0xe6   :  { %v521_v36 = vsel %vm516_vm1, %v1496_v34, 0.0  ;;  %v439_v37 = vpop.f32.mrf.mxu2 }
  0xe7   :  { %v522_v38 = vadd.f32 %v521_v36, %v1494_v33 }
  0xe9   :  { %v380_v39 = vpop.f32.mrf.mxu3  ;;  %523 = vadd.xlane.f32.xlu0 %v522_v38  ;;  %v274_v40 = vpop.f32.mrf.mxu1 }
  0xea   :  { %v434_v41 = vadd.f32 %v433_v14, %v380_v39  ;;  %v275_v43 = vadd.f32 %v274_v40, %v221_v0  ;;  %v486_v44 = vpop.f32.mrf.mxu0 }
  0xec   :  { %v1501_v16 = vadd.f32 %v327_v61, %v275_v43  ;;  %v1503_v35 = vadd.f32 %v486_v44, %v434_v41 }
  0xee   :  { %v525_v46 = vsel %vm516_vm1, %v1503_v35, 0.0  ;;  %v442_v47 = vpop.f32.mrf.mxu2 }
  0xef   :  { %v526_v9 = vadd.f32 %v525_v46, %v1501_v16 }
  0xf1   :  { %v383_v20 = vpop.f32.mrf.mxu3  ;;  %527 = vadd.xlane.f32.xlu1 %v526_v9  ;;  %v277_v42 = vpop.f32.mrf.mxu1 }
  0xf2   :  { %v437_v48 = vadd.f32 %v436_v25, %v383_v20  ;;  %v278_v49 = vadd.f32 %v277_v42, %v224_v4  ;;  %v489_v45 = vpop.f32.mrf.mxu0 }
  0xf4   :  { %v1508_v51 = vadd.f32 %v330_v1, %v278_v49  ;;  %v1510_v54 = vadd.f32 %v489_v45, %v437_v48 }
  0xf6   :  { %v529_v55 = vsel %vm516_vm1, %v1510_v54, 0.0  ;;  %v445_v56 = vpop.f32.mrf.mxu2 }
  0xf7   :  { %v530_v59 = vadd.f32 %v529_v55, %v1508_v51 }
  0xf9   :  { %v386_v60 = vpop.f32.mrf.mxu3  ;;  %531 = vadd.xlane.f32.xlu1 %v530_v59  ;;  %v280_v61 = vpop.f32.mrf.mxu1 }
  0xfa   :  { %v440_v0 = vadd.f32 %v439_v37, %v386_v60  ;;  %v281_v5 = vadd.f32 %v280_v61, %v227_v8  ;;  %v492_v10 = vpop.f32.mrf.mxu0 }
  0xfc   :  { %v1516_v14 = vadd.f32 %v1436_v32, %v281_v5  ;;  %v1518_v4 = vadd.f32 %v492_v10, %v440_v0 }
  0xfe   :  { %v533_v1 = vsel %vm516_vm1, %v1518_v4, 0.0  ;;  %v448_v15 = vpop.f32.mrf.mxu2 }
  0xff   :  { %v534_v17 = vadd.f32 %v533_v1, %v1516_v14 }
 0x101   :  { %v389_v18 = vpop.f32.mrf.mxu3  ;;  %535 = vadd.xlane.f32.xlu2 %v534_v17  ;;  %v283_v19 = vpop.f32.mrf.mxu1 }
 0x102   :  { %v443_v21 = vadd.f32 %v442_v47, %v389_v18  ;;  %v284_v24 = vadd.f32 %v283_v19, %v230_v13  ;;  %v495_v25 = vpop.f32.mrf.mxu0 }
 0x104   :  { %v1524_v8 = vadd.f32 %v1444_v50, %v284_v24  ;;  %v1526_v26 = vadd.f32 %v495_v25, %v443_v21 }
 0x106   :  { %v537_v32 = vsel %vm516_vm1, %v1526_v26, 0.0  ;;  %v451_v28 = vpop.f32.mrf.mxu2 }
 0x107   :  { %v538_v27 = vadd.f32 %v537_v32, %v1524_v8 }
 0x109   :  { %v392_v29 = vpop.f32.mrf.mxu3  ;;  %539 = vadd.xlane.f32.xlu2 %v538_v27  ;;  %v286_v30 = vpop.f32.mrf.mxu1 }
 0x10a   :  { %v446_v31 = vadd.f32 %v445_v56, %v392_v29  ;;  %v287_v36 = vadd.f32 %v286_v30, %v1456_v53  ;;  %v498_v37 = vpop.f32.mrf.mxu0 }
 0x10c   :  { %v1533_v13 = vadd.f32 %v1454_v52, %v287_v36  ;;  %v1535_v50 = vadd.f32 %v498_v37, %v446_v31 }
 0x10e   :  { %v541_v38 = vsel %vm516_vm1, %v1535_v50, 0.0  ;;  %v454_v47 = vpop.f32.mrf.mxu2 }
 0x10f   :  { %v542_v39 = vadd.f32 %v541_v38, %v1533_v13 }
 0x111   :  { %v395_v40 = vpop.f32.mrf.mxu3  ;;  %543 = vadd.xlane.f32.xlu0 %v542_v39  ;;  %v289_v41 = vpop.f32.mrf.mxu1 }
 0x112   :  { %v449_v43 = vadd.f32 %v448_v15, %v395_v40  ;;  %v290_v44 = vadd.f32 %v289_v41, %v1466_v58  ;;  %v501_v46 = vpop.f32.mrf.mxu0  ;;  %v932_v40 = vld [vmem:[%s1937_s4 + $0x38] sm:$0xff]  ;;  %v1588_v41 = vpop.permute.xlu0 %944 }
 0x114   :  { %v1542_v53 = vadd.f32 %v1464_v57, %v290_v44  ;;  %v1544_v52 = vadd.f32 %v501_v46, %v449_v43  ;;  %v933_v43 = vld [vmem:[%s1937_s4 + $0x40] sm:$0xff]  ;;  %v1598_v44 = vpop.permute.xlu1 %939 }
 0x116   :  { %v545_v9 = vsel %vm516_vm1, %v1544_v52, 0.0  ;;  %v457_v57 = vpop.f32.mrf.mxu2 }
 0x117   :  { %v546_v20 = vadd.f32 %v545_v9, %v1542_v53 }
 0x119   :  { %v398_v42 = vpop.f32.mrf.mxu3  ;;  %547 = vadd.xlane.f32.xlu1 %v546_v20  ;;  %v292_v48 = vpop.f32.mrf.mxu1 }
 0x11a   :  { %v452_v49 = vadd.f32 %v451_v28, %v398_v42  ;;  %v293_v45 = vadd.f32 %v292_v48, %v1473_v63  ;;  %v504_v55 = vpop.f32.mrf.mxu0 }
 0x11c   :  { %v1551_v58 = vadd.f32 %v1471_v62, %v293_v45  ;;  %v1553_v56 = vadd.f32 %v504_v55, %v452_v49  ;;  %v1603_v20 = vpop.permute.xlu1 %954  ;;  %v1612_v55 = vpop.permute.xlu2 %949 }
 0x11e   :  { %v549_v59 = vsel %vm516_vm1, %v1553_v56, 0.0  ;;  %v460_v17 = vpop.f32.mrf.mxu2 }
 0x11f   :  { %v550_v60 = vadd.f32 %v549_v59, %v1551_v58 }
 0x121   :  { %v401_v61 = vpop.f32.mrf.mxu3  ;;  %551 = vadd.xlane.f32.xlu2 %v550_v60  ;;  %v295_v0 = vpop.f32.mrf.mxu1 }
 0x122   :  { %v455_v5 = vadd.f32 %v454_v47, %v401_v61  ;;  %v296_v10 = vadd.f32 %v295_v0, %v1477_v3  ;;  %v507_v1 = vpop.f32.mrf.mxu0 }
 0x124   :  { %v1560_v63 = vadd.f32 %v1475_v2, %v296_v10  ;;  %v1562_v62 = vadd.f32 %v507_v1, %v455_v5  ;;  %v1623_v10 = vpop.permute.xlu2 %964 }
 0x126   :  { %v553_v15 = vsel %vm516_vm1, %v1562_v62, 0.0  ;;  %v513_v29 = vpop.f32.mrf.mxu2 }
 0x127   :  { %v554_v18 = vadd.f32 %v553_v15, %v1560_v63 }
 0x129   :  { %v404_v19 = vpop.f32.mrf.mxu3  ;;  %555 = vadd.xlane.f32.xlu0 %v554_v18  ;;  %v298_v21 = vpop.f32.mrf.mxu1 }
 0x12a   :  { %v458_v24 = vadd.f32 %v457_v57, %v404_v19  ;;  %v299_v25 = vadd.f32 %v298_v21, %v1481_v7  ;;  %v510_v32 = vpop.f32.mrf.mxu0 }
 0x12c   :  { %v1569_v3 = vadd.f32 %v1479_v6, %v299_v25  ;;  %v1571_v2 = vadd.f32 %v510_v32, %v458_v24 }
 0x12e   :  { %v557_v27 = vsel %vm516_vm1, %v1571_v2, 0.0 }
 0x12f   :  { %v558_v28 = vadd.f32 %v557_v27, %v1569_v3 }
 0x131   :  { %v407_v30 = vpop.f32.mrf.mxu3  ;;  %559 = vadd.xlane.f32.xlu1 %v558_v28  ;;  %v301_v31 = vpop.f32.mrf.mxu1 }
 0x132   :  { %v461_v36 = vadd.f32 %v460_v17, %v407_v30  ;;  %v302_v37 = vadd.f32 %v301_v31, %v1485_v12  ;;  %v1593_v12 = vpop.permute.xlu0 %959 }
 0x134   :  { %v1578_v7 = vadd.f32 %v1483_v11, %v302_v37  ;;  %v1580_v38 = vadd.f32 %v513_v29, %v461_v36  ;;  %v931_v11 = vld [vmem:[%s1937_s4 + $0x30] sm:$0xff] }
 0x136   :  { %v561_v6 = vsel %vm516_vm1, %v1580_v38, 0.0 }
 0x137   :  { %v562_v39 = vadd.f32 %v561_v6, %v1578_v7 }
 0x139   :  { %563 = vadd.xlane.f32.xlu2 %v562_v39 }
 0x13d   :  { %974 = vperm.xlu0 %1170, %v932_v40  }
 0x14a   :  { %969 = vperm.xlu1 %1169, %v931_v11  }
 0x151   :  { %979 = vperm.xlu2 %1171, %v933_v43  }
 0x154   :  { %v520_v46 = vpop.xlane.xlu0 %519 }
 0x155   :  { %v565_v47 = vmul.f32 0.0051020407, %v520_v46 }
 0x157   :  { %v1601_v9 = vsub.f32 %v1489_v23, %v565_v47  ;;  %v1606_v42 = vsub.f32 %v1487_v22, %v565_v47 }
 0x159   :  { %v602_v48 = vmul.f32 %v1601_v9, %v1601_v9  ;;  %v601_v45 = vmul.f32 %v1606_v42, %v1606_v42 }
 0x15b   :  { %v625_v57 = vsel %vm516_vm1, %v602_v48, 0.0 }
 0x15c   :  { %v524_v49 = vpop.xlane.xlu0 %523  ;;  %v626_v23 = vadd.f32 %v625_v57, %v601_v45 }
 0x15d   :  { %v566_v59 = vmul.f32 0.0051020407, %v524_v49 }
 0x15f   :  { %v1616_v61 = vsub.f32 %v1496_v34, %v566_v59  ;;  %v1619_v0 = vsub.f32 %v1494_v33, %v566_v59 }
 0x161   :  { %v604_v5 = vmul.f32 %v1616_v61, %v1616_v61  ;;  %v603_v18 = vmul.f32 %v1619_v0, %v1619_v0 }
 0x163   :  { %v629_v33 = vsel %vm516_vm1, %v604_v5, 0.0 }
 0x164   :  { %v528_v60 = vpop.xlane.xlu1 %527  ;;  %v630_v32 = vadd.f32 %v629_v33, %v603_v18 }
 0x165   :  { %v567_v22 = vmul.f32 0.0051020407, %v528_v60 }
 0x167   :  { %627 = vadd.xlane.f32.xlu0 %v626_v23  ;;  %v1626_v15 = vsub.f32 %v1503_v35, %v567_v22  ;;  %v1638_v21 = vsub.f32 %v1501_v16, %v567_v22 }
 0x169   :  { %v606_v25 = vmul.f32 %v1626_v15, %v1626_v15  ;;  %v605_v28 = vmul.f32 %v1638_v21, %v1638_v21 }
 0x16b   :  { %v633_v29 = vsel %vm516_vm1, %v606_v25, 0.0 }
 0x16c   :  { %v532_v1 = vpop.xlane.xlu1 %531  ;;  %v634_v36 = vadd.f32 %v633_v29, %v605_v28 }
 0x16d   :  { %v568_v17 = vmul.f32 0.0051020407, %v532_v1 }
 0x16f   :  { %v1631_v34 = vsub.f32 %v1508_v51, %v568_v17  ;;  %v1634_v19 = vsub.f32 %v1510_v54, %v568_v17 }
 0x171   :  { %v607_v24 = vmul.f32 %v1631_v34, %v1631_v34  ;;  %v608_v35 = vmul.f32 %v1634_v19, %v1634_v19 }
 0x173   :  { %v637_v51 = vsel %vm516_vm1, %v608_v35, 0.0 }
 0x174   :  { %v536_v27 = vpop.xlane.xlu2 %535  ;;  %631 = vadd.xlane.f32.xlu1 %v630_v32  ;;  %v638_v54 = vadd.f32 %v637_v51, %v607_v24 }
 0x175   :  { %v569_v16 = vmul.f32 0.0051020407, %v536_v27 }
 0x176   :  { %639 = vadd.xlane.f32.xlu0 %v638_v54 }
 0x177   :  { %v1651_v30 = vsub.f32 %v1516_v14, %v569_v16  ;;  %v1654_v31 = vsub.f32 %v1518_v4, %v569_v16 }
 0x179   :  { %v609_v37 = vmul.f32 %v1651_v30, %v1651_v30  ;;  %v610_v6 = vmul.f32 %v1654_v31, %v1654_v31 }
 0x17a   :  { %635 = vadd.xlane.f32.xlu2 %v634_v36 }
 0x17b   :  { %v641_v39 = vsel %vm516_vm1, %v610_v6, 0.0 }
 0x17c   :  { %v540_v40 = vpop.xlane.xlu2 %539  ;;  %v642_v11 = vadd.f32 %v641_v39, %v609_v37 }
 0x17d   :  { %v570_v43 = vmul.f32 0.0051020407, %v540_v40 }
 0x17e   :  { %643 = vadd.xlane.f32.xlu1 %v642_v11 }
 0x17f   :  { %v1662_v14 = vsub.f32 %v1524_v8, %v570_v43  ;;  %v1665_v4 = vsub.f32 %v1526_v26, %v570_v43 }
 0x181   :  { %v611_v46 = vmul.f32 %v1662_v14, %v1662_v14  ;;  %v612_v47 = vmul.f32 %v1665_v4, %v1665_v4 }
 0x183   :  { %v645_v48 = vsel %vm516_vm1, %v612_v47, 0.0 }
 0x184   :  { %v544_v49 = vpop.xlane.xlu0 %543  ;;  %v646_v45 = vadd.f32 %v645_v48, %v611_v46 }
 0x185   :  { %v571_v57 = vmul.f32 0.0051020407, %v544_v49 }
 0x186   :  { %647 = vadd.xlane.f32.xlu2 %v646_v45 }
 0x187   :  { %v1673_v59 = vsub.f32 %v1533_v13, %v571_v57  ;;  %v1676_v8 = vsub.f32 %v1535_v50, %v571_v57 }
 0x189   :  { %v613_v26 = vmul.f32 %v1673_v59, %v1673_v59  ;;  %v614_v60 = vmul.f32 %v1676_v8, %v1676_v8 }
 0x18b   :  { %v649_v23 = vsel %vm516_vm1, %v614_v60, 0.0 }
 0x18c   :  { %v548_v22 = vpop.xlane.xlu1 %547  ;;  %v650_v5 = vadd.f32 %v649_v23, %v613_v26 }
 0x18d   :  { %v572_v1 = vmul.f32 0.0051020407, %v548_v22 }
 0x18e   :  { %651 = vadd.xlane.f32.xlu0 %v650_v5 }
 0x18f   :  { %v1684_v17 = vsub.f32 %v1542_v53, %v572_v1  ;;  %v1687_v13 = vsub.f32 %v1544_v52, %v572_v1 }
 0x191   :  { %v615_v50 = vmul.f32 %v1684_v17, %v1684_v17  ;;  %v616_v18 = vmul.f32 %v1687_v13, %v1687_v13 }
 0x193   :  { %v653_v33 = vsel %vm516_vm1, %v616_v18, 0.0 }
 0x194   :  { %v552_v24 = vpop.xlane.xlu2 %551  ;;  %v654_v35 = vadd.f32 %v653_v33, %v615_v50 }
 0x195   :  { %v573_v25 = vmul.f32 0.0051020407, %v552_v24 }
 0x196   :  { %655 = vadd.xlane.f32.xlu1 %v654_v35 }
 0x197   :  { %v1695_v32 = vsub.f32 %v1551_v58, %v573_v25  ;;  %v1698_v53 = vsub.f32 %v1553_v56, %v573_v25 }
 0x199   :  { %v617_v52 = vmul.f32 %v1695_v32, %v1695_v32  ;;  %v618_v51 = vmul.f32 %v1698_v53, %v1698_v53 }
 0x19b   :  { %v657_v27 = vsel %vm516_vm1, %v618_v51, 0.0 }
 0x19c   :  { %v556_v54 = vpop.xlane.xlu0 %555  ;;  %v658_v28 = vadd.f32 %v657_v27, %v617_v52 }
 0x19d   :  { %v574_v16 = vmul.f32 0.0051020407, %v556_v54 }
 0x19e   :  { %659 = vadd.xlane.f32.xlu2 %v658_v28 }
 0x19f   :  { %v1706_v29 = vsub.f32 %v1560_v63, %v574_v16  ;;  %v1709_v58 = vsub.f32 %v1562_v62, %v574_v16 }
 0x1a1   :  { %v619_v56 = vmul.f32 %v1706_v29, %v1706_v29  ;;  %v620_v36 = vmul.f32 %v1709_v58, %v1709_v58 }
 0x1a3   :  { %v661_v37 = vsel %vm516_vm1, %v620_v36, 0.0  ;;  %v685_v36 = vld [vmem:[%s1936_s3] sm:$0xff] }
 0x1a4   :  { %v560_v6 = vpop.xlane.xlu1 %559  ;;  %v662_v39 = vadd.f32 %v661_v37, %v619_v56 }
 0x1a5   :  { %v575_v40 = vmul.f32 0.0051020407, %v560_v6 }
 0x1a6   :  { %663 = vadd.xlane.f32.xlu0 %v662_v39 }
 0x1a7   :  { %v1717_v11 = vsub.f32 %v1569_v3, %v575_v40  ;;  %v1720_v63 = vsub.f32 %v1571_v2, %v575_v40 }
 0x1a9   :  { %v621_v62 = vmul.f32 %v1717_v11, %v1717_v11  ;;  %v622_v43 = vmul.f32 %v1720_v63, %v1720_v63 }
 0x1ab   :  { %v665_v46 = vsel %vm516_vm1, %v622_v43, 0.0 }
 0x1ac   :  { %v564_v47 = vpop.xlane.xlu2 %563  ;;  %v666_v48 = vadd.f32 %v665_v46, %v621_v62 }
 0x1ad   :  { %v576_v49 = vmul.f32 0.0051020407, %v564_v47 }
 0x1ae   :  { %667 = vadd.xlane.f32.xlu1 %v666_v48 }
 0x1af   :  { %v1728_v45 = vsub.f32 %v1578_v7, %v576_v49  ;;  %v1731_v3 = vsub.f32 %v1580_v38, %v576_v49  ;;  %v1738_v23 = vpop.permute.xlu0 %974 }
 0x1b1   :  { %v623_v2 = vmul.f32 %v1728_v45, %v1728_v45  ;;  %v624_v57 = vmul.f32 %v1731_v3, %v1731_v3 }
 0x1b3   :  { %v669_v26 = vsel %vm516_vm1, %v624_v57, 0.0 }
 0x1b4   :  { %v670_v60 = vadd.f32 %v669_v26, %v623_v2  ;;  %v1742_v50 = vpop.permute.xlu2 %979 }
 0x1b6   :  { %671 = vadd.xlane.f32.xlu2 %v670_v60 }
 0x1bc   :  { %v1740_v7 = vpop.permute.xlu1 %969 }
 0x1da   :  { %v628_v22 = vpop.xlane.xlu0 %627 }
 0x1db   :  { %v673_v5 = vmul.f32 0.0051020407, %v628_v22 }
 0x1dd   :  { %v697_v1 = vadd.f32 1e-05, %v673_v5 }
 0x1df   :  { %1172 = vrsqrt.f32 %v697_v1  ;;  %vm715_vm3 = vweird.f32 %v697_v1 }
 0x1e5   :  { %v1173_v38 = vpop.eup %1172 }
 0x1e6   :  { %v710_v18 = vmul.f32 %v1173_v38, %v697_v1  ;;  %vm716_vm2 = vweird.f32 %v1173_v38 }
 0x1e7   :  { %v632_v33 = vpop.xlane.xlu1 %631  ;;  %vm717_vm4 = vmor %vm715_vm3, %vm716_vm2 }
 0x1e8   :  { %v711_v24 = vmul.f32 %v1173_v38, %v710_v18  ;;  %v674_v35 = vmul.f32 0.0051020407, %v632_v33 }
 0x1e9   :  { %v640_v25 = vpop.xlane.xlu0 %639 }
 0x1ea   :  { %v712_v52 = vmul.f32 0.5, %v711_v24  ;;  %v698_v51 = vadd.f32 1e-05, %v674_v35  ;;  %v676_v27 = vmul.f32 0.0051020407, %v640_v25  ;;  %v686_v24 = vld [vmem:[%s1936_s3 + $0x8] sm:$0xff] }
 0x1ec   :  { %v713_v54 = vsub.f32 1.5, %v712_v52  ;;  %1174 = vrsqrt.f32 %v698_v51  ;;  %v1744_v28 = vadd.f32 1e-05, %v676_v27  ;;  %vm725_vm6 = vweird.f32 %v698_v51 }
 0x1ed   :  { %v636_v16 = vpop.xlane.xlu2 %635 }
 0x1ee   :  { %1176 = vrsqrt.f32 %v1744_v28  ;;  %v675_v56 = vmul.f32 0.0051020407, %v636_v16  ;;  %v714_v37 = vmul.f32 %v1173_v38, %v713_v54  ;;  %vm745_vm15 = vweird.f32 %v1744_v28 }
 0x1f0   :  { %v699_v6 = vadd.f32 1e-05, %v675_v56  ;;  %v718_v39 = vsel %vm717_vm4, %v1173_v38, %v714_v37 }
 0x1f1   :  { %v644_v40 = vpop.xlane.xlu1 %643  ;;  %v829_v62 = vmul.f32 %v718_v39, %v685_v36 }
 0x1f2   :  { %v1175_v43 = vpop.eup %1174  ;;  %1178 = vrsqrt.f32 %v699_v6  ;;  %v677_v46 = vmul.f32 0.0051020407, %v644_v40  ;;  %vm735_vm9 = vweird.f32 %v699_v6 }
 0x1f3   :  { %v720_v47 = vmul.f32 %v1175_v43, %v698_v51  ;;  %843 = vperm.xlu0 %1170, %v829_v62   ;;  %vm726_vm5 = vweird.f32 %v1175_v43 }
 0x1f4   :  { %v1750_v48 = vpop.eup %1176  ;;  %v701_v49 = vadd.f32 1e-05, %v677_v46  ;;  %vm727_vm7 = vmor %vm725_vm6, %vm726_vm5  ;;  %v687_v46 = vld [vmem:[%s1936_s3 + $0x10] sm:$0xff] }
 0x1f5   :  { %v721_v2 = vmul.f32 %v1175_v43, %v720_v47  ;;  %v740_v57 = vmul.f32 %v1750_v48, %v1744_v28  ;;  %vm746_vm12 = vweird.f32 %v1750_v48 }
 0x1f6   :  { %1180 = vrsqrt.f32 %v701_v49  ;;  %vm755_vm13 = vweird.f32 %v701_v49  ;;  %vm747_vm0 = vmor %vm745_vm15, %vm746_vm12 }
 0x1f7   :  { %v722_v26 = vmul.f32 0.5, %v721_v2  ;;  %v741_v5 = vmul.f32 %v1750_v48, %v740_v57 }
 0x1f8   :  { %v1179_v60 = vpop.eup %1178 }
 0x1f9   :  { %v723_v22 = vsub.f32 1.5, %v722_v26  ;;  %v730_v1 = vmul.f32 %v1179_v60, %v699_v6  ;;  %v648_v38 = vpop.xlane.xlu2 %647  ;;  %v742_v27 = vmul.f32 0.5, %v741_v5  ;;  %vm736_vm8 = vweird.f32 %v1179_v60  ;;  %v689_v6 = vld [vmem:[%s1936_s3 + $0x20] sm:$0xff] }
 0x1fa   :  { %v678_v18 = vmul.f32 0.0051020407, %v648_v38  ;;  %vm737_vm10 = vmor %vm735_vm9, %vm736_vm8 }
 0x1fb   :  { %v731_v33 = vmul.f32 %v1179_v60, %v730_v1  ;;  %v724_v35 = vmul.f32 %v1175_v43, %v723_v22  ;;  %v743_v51 = vsub.f32 1.5, %v742_v27 }
 0x1fc   :  { %v1181_v25 = vpop.eup %1180  ;;  %v702_v52 = vadd.f32 1e-05, %v678_v18 }
 0x1fd   :  { %v732_v54 = vmul.f32 0.5, %v731_v33  ;;  %v750_v16 = vmul.f32 %v1181_v25, %v701_v49  ;;  %v728_v56 = vsel %vm727_vm7, %v1175_v43, %v724_v35  ;;  %vm756_vm11 = vweird.f32 %v1181_v25  ;;  %v688_v49 = vld [vmem:[%s1936_s3 + $0x18] sm:$0xff] }
 0x1fe   :  { %1182 = vrsqrt.f32 %v702_v52  ;;  %v830_v36 = vmul.f32 %v728_v56, %v686_v24  ;;  %v744_v18 = vmul.f32 %v1750_v48, %v743_v51  ;;  %vm757_vm14 = vmor %vm755_vm13, %vm756_vm11  ;;  %vm765_vm3 = vweird.f32 %v702_v52 }
 0x1ff   :  { %v733_v37 = vsub.f32 1.5, %v732_v54  ;;  %v751_v39 = vmul.f32 %v1181_v25, %v750_v16 }
 0x200   :  { %848 = vperm.xlu1 %1169, %v830_v36   ;;  %v748_v54 = vsel %vm747_vm0, %v1750_v48, %v744_v18  ;;  %v690_v48 = vld [vmem:[%s1936_s3 + $0x28] sm:$0xff] }
 0x201   :  { %v752_v40 = vmul.f32 0.5, %v751_v39  ;;  %v652_v62 = vpop.xlane.xlu0 %651  ;;  %v734_v47 = vmul.f32 %v1179_v60, %v733_v37  ;;  %v832_v39 = vmul.f32 %v748_v54, %v688_v49  ;;  %v692_v54 = vld [vmem:[%s1936_s3 + $0x38] sm:$0xff] }
 0x202   :  { %v679_v2 = vmul.f32 0.0051020407, %v652_v62 }
 0x203   :  { %v753_v57 = vsub.f32 1.5, %v752_v40  ;;  %v738_v43 = vsel %vm737_vm10, %v1179_v60, %v734_v47 }
 0x204   :  { %v1183_v26 = vpop.eup %1182  ;;  %v703_v22 = vadd.f32 1e-05, %v679_v2  ;;  %v831_v5 = vmul.f32 %v738_v43, %v687_v46 }
 0x205   :  { %v760_v1 = vmul.f32 %v1183_v26, %v702_v52  ;;  %v754_v38 = vmul.f32 %v1181_v25, %v753_v57  ;;  %vm766_vm2 = vweird.f32 %v1183_v26  ;;  %v691_v52 = vld [vmem:[%s1936_s3 + $0x30] sm:$0xff] }
 0x206   :  { %1184 = vrsqrt.f32 %v703_v22  ;;  %853 = vperm.xlu2 %1171, %v831_v5   ;;  %vm767_vm4 = vmor %vm765_vm3, %vm766_vm2  ;;  %vm775_vm6 = vweird.f32 %v703_v22 }
 0x207   :  { %v761_v60 = vmul.f32 %v1183_v26, %v760_v1  ;;  %v758_v33 = vsel %vm757_vm14, %v1181_v25, %v754_v38 }
 0x208   :  { %v833_v24 = vmul.f32 %v758_v33, %v689_v6 }
 0x209   :  { %v762_v35 = vmul.f32 0.5, %v761_v60  ;;  %v656_v27 = vpop.xlane.xlu1 %655 }
 0x20a   :  { %v680_v16 = vmul.f32 0.0051020407, %v656_v27  ;;  %863 = vperm.xlu1 %1169, %v833_v24  }
 0x20b   :  { %v763_v56 = vsub.f32 1.5, %v762_v35 }
 0x20c   :  { %v1185_v36 = vpop.eup %1184  ;;  %v704_v37 = vadd.f32 1e-05, %v680_v16 }
 0x20d   :  { %v770_v28 = vmul.f32 %v1185_v36, %v703_v22  ;;  %v764_v51 = vmul.f32 %v1183_v26, %v763_v56  ;;  %vm776_vm5 = vweird.f32 %v1185_v36 }
 0x20e   :  { %1186 = vrsqrt.f32 %v704_v37  ;;  %858 = vperm.xlu2 %1171, %v832_v39   ;;  %vm777_vm7 = vmor %vm775_vm6, %vm776_vm5  ;;  %vm785_vm9 = vweird.f32 %v704_v37 }
 0x20f   :  { %v771_v25 = vmul.f32 %v1185_v36, %v770_v28  ;;  %v768_v46 = vsel %vm767_vm4, %v1183_v26, %v764_v51 }
 0x210   :  { %v834_v5 = vmul.f32 %v768_v46, %v690_v48  ;;  %v693_v46 = vld [vmem:[%s1936_s3 + $0x40] sm:$0xff] }
 0x211   :  { %v772_v40 = vmul.f32 0.5, %v771_v25  ;;  %v660_v62 = vpop.xlane.xlu2 %659 }
 0x212   :  { %v681_v47 = vmul.f32 0.0051020407, %v660_v62 }
 0x213   :  { %v773_v2 = vsub.f32 1.5, %v772_v40 }
 0x214   :  { %v1187_v57 = vpop.eup %1186  ;;  %v705_v43 = vadd.f32 1e-05, %v681_v47 }
 0x215   :  { %v780_v1 = vmul.f32 %v1187_v57, %v704_v37  ;;  %v774_v6 = vmul.f32 %v1185_v36, %v773_v2  ;;  %vm786_vm8 = vweird.f32 %v1187_v57 }
 0x216   :  { %1188 = vrsqrt.f32 %v705_v43  ;;  %868 = vperm.xlu2 %1171, %v834_v5   ;;  %vm787_vm10 = vmor %vm785_vm9, %vm786_vm8  ;;  %vm795_vm12 = vweird.f32 %v705_v43 }
 0x217   :  { %v781_v38 = vmul.f32 %v1187_v57, %v780_v1  ;;  %v778_v18 = vsel %vm777_vm7, %v1185_v36, %v774_v6 }
 0x218   :  { %v835_v60 = vmul.f32 %v778_v18, %v691_v52 }
 0x219   :  { %v782_v26 = vmul.f32 0.5, %v781_v38  ;;  %v664_v33 = vpop.xlane.xlu0 %663 }
 0x21a   :  { %v682_v24 = vmul.f32 0.0051020407, %v664_v33  ;;  %873 = vperm.xlu1 %1169, %v835_v60  }
 0x21b   :  { %v783_v35 = vsub.f32 1.5, %v782_v26  ;;  %v694_v26 = vld [vmem:[%s1936_s3 + $0x48] sm:$0xff] }
 0x21c   :  { %v1189_v27 = vpop.eup %1188  ;;  %v706_v22 = vadd.f32 1e-05, %v682_v24 }
 0x21d   :  { %v790_v49 = vmul.f32 %v1189_v27, %v705_v43  ;;  %v784_v16 = vmul.f32 %v1187_v57, %v783_v35  ;;  %vm796_vm11 = vweird.f32 %v1189_v27 }
 0x21e   :  { %1190 = vrsqrt.f32 %v706_v22  ;;  %vm797_vm13 = vmor %vm795_vm12, %vm796_vm11  ;;  %vm805_vm15 = vweird.f32 %v706_v22 }
 0x21f   :  { %v791_v56 = vmul.f32 %v1189_v27, %v790_v49  ;;  %v788_v36 = vsel %vm787_vm10, %v1187_v57, %v784_v16 }
 0x220   :  { %v836_v39 = vmul.f32 %v788_v36, %v692_v54 }
 0x221   :  { %v792_v28 = vmul.f32 0.5, %v791_v56  ;;  %v668_v51 = vpop.xlane.xlu1 %667 }
 0x222   :  { %v683_v25 = vmul.f32 0.0051020407, %v668_v51  ;;  %878 = vperm.xlu0 %1170, %v836_v39   ;;  %v934_v51 = vld [vmem:[%s1937_s4 + $0x48] sm:$0xff] }
 0x223   :  { %v793_v40 = vsub.f32 1.5, %v792_v28 }
 0x224   :  { %v1191_v62 = vpop.eup %1190  ;;  %v707_v48 = vadd.f32 1e-05, %v683_v25 }
 0x225   :  { %v800_v37 = vmul.f32 %v1191_v62, %v706_v22  ;;  %v794_v47 = vmul.f32 %v1189_v27, %v793_v40  ;;  %vm806_vm14 = vweird.f32 %v1191_v62  ;;  %v695_v22 = vld [vmem:[%s1936_s3 + $0x50] sm:$0xff] }
 0x226   :  { %1192 = vrsqrt.f32 %v707_v48  ;;  %vm807_vm0 = vmor %vm805_vm15, %vm806_vm14  ;;  %vm815_vm3 = vweird.f32 %v707_v48 }
 0x227   :  { %v801_v2 = vmul.f32 %v1191_v62, %v800_v37  ;;  %v798_v57 = vsel %vm797_vm13, %v1189_v27, %v794_v47 }
 0x228   :  { %v837_v5 = vmul.f32 %v798_v57, %v693_v46  ;;  %v935_v46 = vld [vmem:[%s1937_s4 + $0x50] sm:$0xff]  ;;  %v936_v57 = vld [vmem:[%s1937_s4 + $0x58] sm:$0xff] }
 0x229   :  { %v802_v1 = vmul.f32 0.5, %v801_v2  ;;  %v672_v52 = vpop.xlane.xlu2 %671 }
 0x22a   :  { %v684_v6 = vmul.f32 0.0051020407, %v672_v52  ;;  %883 = vperm.xlu2 %1171, %v837_v5  }
 0x22b   :  { %v803_v38 = vsub.f32 1.5, %v802_v1 }
 0x22c   :  { %v1193_v18 = vpop.eup %1192  ;;  %v708_v60 = vadd.f32 1e-05, %v684_v6  ;;  %v1025_v6 = vld [vmem:[%s1935_s2 + $0x20] sm:$0xff] }
 0x22d   :  { %v810_v43 = vmul.f32 %v1193_v18, %v707_v48  ;;  %v804_v33 = vmul.f32 %v1191_v62, %v803_v38  ;;  %vm816_vm2 = vweird.f32 %v1193_v18  ;;  %v696_v48 = vld [vmem:[%s1936_s3 + $0x58] sm:$0xff]  ;;  %v1026_v38 = vld [vmem:[%s1935_s2 + $0x28] sm:$0xff] }
 0x22e   :  { %1194 = vrsqrt.f32 %v708_v60  ;;  %vm817_vm4 = vmor %vm815_vm3, %vm816_vm2  ;;  %vm825_vm6 = vweird.f32 %v708_v60 }
 0x22f   :  { %v811_v24 = vmul.f32 %v1193_v18, %v810_v43  ;;  %v808_v35 = vsel %vm807_vm0, %v1191_v62, %v804_v33 }
 0x230   :  { %v838_v27 = vmul.f32 %v808_v35, %v694_v26  ;;  %v1022_v35 = vld [vmem:[%s1935_s2 + $0x8] sm:$0xff] }
 0x231   :  { %v812_v49 = vmul.f32 0.5, %v811_v24 }
 0x232   :  { %888 = vperm.xlu1 %1169, %v838_v27  }
 0x233   :  { %v813_v54 = vsub.f32 1.5, %v812_v49 }
 0x234   :  { %v1195_v16 = vpop.eup %1194 }
 0x235   :  { %v820_v56 = vmul.f32 %v1195_v16, %v708_v60  ;;  %v814_v36 = vmul.f32 %v1193_v18, %v813_v54  ;;  %vm826_vm5 = vweird.f32 %v1195_v16 }
 0x236   :  { %vm827_vm7 = vmor %vm825_vm6, %vm826_vm5 }
 0x237   :  { %v821_v39 = vmul.f32 %v1195_v16, %v820_v56  ;;  %v818_v28 = vsel %vm817_vm4, %v1193_v18, %v814_v36  ;;  %v1027_v56 = vld [vmem:[%s1935_s2 + $0x30] sm:$0xff] }
 0x238   :  { %v839_v25 = vmul.f32 %v818_v28, %v695_v22  ;;  %v1028_v22 = vld [vmem:[%s1935_s2 + $0x38] sm:$0xff] }
 0x239   :  { %v822_v40 = vmul.f32 0.5, %v821_v39 }
 0x23a   :  { %893 = vperm.xlu0 %1170, %v839_v25   ;;  %984 = vperm.xlu1 %1169, %v934_v51   ;;  %v1031_v25 = vld [vmem:[%s1935_s2 + $0x50] sm:$0xff] }
 0x23b   :  { %v823_v62 = vsub.f32 1.5, %v822_v40 }
 0x23d   :  { %v824_v37 = vmul.f32 %v1195_v16, %v823_v62 }
 0x23f   :  { %v828_v47 = vsel %vm827_vm7, %v1195_v16, %v824_v37 }
 0x240   :  { %v840_v2 = vmul.f32 %v828_v47, %v696_v48 }
 0x242   :  { %989 = vperm.xlu0 %1170, %v935_v46   ;;  %898 = vperm.xlu2 %1171, %v840_v2  }
 0x24a   :  { %994 = vperm.xlu2 %1171, %v936_v57  }
 0x260   :  { %v854_v5 = vpop.permute.xlu2 %853 }
 0x261   :  { %v905_v1 = vmul.f32 %v854_v5, %v1638_v21  ;;  %v906_v52 = vmul.f32 %v854_v5, %v1626_v15  ;;  %v1021_v15 = vld [vmem:[%s1935_s2] sm:$0xff] }
 0x263   :  { %v1001_v18 = vadd.f32 %v1612_v55, %v905_v1  ;;  %v1002_v60 = vadd.f32 %v1612_v55, %v906_v52 }
 0x265   :  { %v1049_v43 = vadd.f32 %v1025_v6, %v1001_v18  ;;  %v1050_v26 = vadd.f32 %v1026_v38, %v1002_v60  ;;  %v844_v33 = vpop.permute.xlu0 %843  ;;  %v1029_v6 = vld [vmem:[%s1935_s2 + $0x40] sm:$0xff] }
 0x266   :  { %v901_v24 = vmul.f32 %v844_v33, %v1606_v42  ;;  %v902_v21 = vmul.f32 %v844_v33, %v1601_v9  ;;  %v1037_v33 = vld [vmem:[%s1935_s2 + $0x80] sm:$0xff] }
 0x267   :  { %1073 = vst [vmem:[#allocation7 + $0x20] sm:$0xff] %v1049_v43 }
 0x268   :  { %1074 = vst.msk [vmem:[#allocation7 + $0x28] sm:$0xff] %vm516_vm1, %v1050_v26  ;;  %v997_v55 = vadd.f32 %v1598_v44, %v901_v24  ;;  %v998_v27 = vadd.f32 %v1598_v44, %v902_v21  ;;  %v859_v49 = vpop.permute.xlu2 %858  ;;  %v1038_v24 = vld [vmem:[%s1935_s2 + $0x88] sm:$0xff] }
 0x269   :  { %v907_v42 = vmul.f32 %v859_v49, %v1631_v34  ;;  %v908_v9 = vmul.f32 %v859_v49, %v1634_v19  ;;  %v1034_v49 = vld [vmem:[%s1935_s2 + $0x68] sm:$0xff] }
 0x26a   :  { %v1045_v54 = vadd.f32 %v1021_v15, %v997_v55  ;;  %v1046_v16 = vadd.f32 %v1022_v35, %v998_v27  ;;  %v1033_v27 = vld [vmem:[%s1935_s2 + $0x60] sm:$0xff] }
 0x26b   :  { %v1003_v36 = vadd.f32 %v1603_v20, %v907_v42  ;;  %v1004_v39 = vadd.f32 %v1603_v20, %v908_v9  ;;  %v1032_v20 = vld [vmem:[%s1935_s2 + $0x58] sm:$0xff] }
 0x26c   :  { %1069 = vst [vmem:[#allocation7] sm:$0xff] %v1045_v54 }
 0x26d   :  { %1070 = vst.msk [vmem:[#allocation7 + $0x8] sm:$0xff] %vm516_vm1, %v1046_v16  ;;  %v1051_v44 = vadd.f32 %v1027_v56, %v1003_v36  ;;  %v1052_v34 = vadd.f32 %v1028_v22, %v1004_v39  ;;  %v1035_v56 = vld [vmem:[%s1935_s2 + $0x70] sm:$0xff]  ;;  %v1036_v22 = vld [vmem:[%s1935_s2 + $0x78] sm:$0xff] }
 0x26f   :  { %1075 = vst [vmem:[#allocation7 + $0x30] sm:$0xff] %v1051_v44 }
 0x270   :  { %1076 = vst.msk [vmem:[#allocation7 + $0x38] sm:$0xff] %vm516_vm1, %v1052_v34  ;;  %v869_v19 = vpop.permute.xlu2 %868 }
 0x271   :  { %v911_v28 = vmul.f32 %v869_v19, %v1662_v14  ;;  %v912_v51 = vmul.f32 %v869_v19, %v1665_v4  ;;  %v1023_v14 = vld [vmem:[%s1935_s2 + $0x10] sm:$0xff]  ;;  %v1024_v4 = vld [vmem:[%s1935_s2 + $0x18] sm:$0xff] }
 0x272   :  { %v849_v40 = vpop.permute.xlu1 %848 }
 0x273   :  { %v1007_v62 = vadd.f32 %v1623_v10, %v911_v28  ;;  %v1008_v48 = vadd.f32 %v1623_v10, %v912_v51  ;;  %v903_v37 = vmul.f32 %v849_v40, %v1619_v0  ;;  %v904_v46 = vmul.f32 %v849_v40, %v1616_v61  ;;  %v1043_v28 = vld [vmem:[%s1935_s2 + $0xb0] sm:$0xff]  ;;  %v1044_v51 = vld [vmem:[%s1935_s2 + $0xb8] sm:$0xff] }
 0x275   :  { %v1055_v47 = vadd.f32 %v1031_v25, %v1007_v62  ;;  %v1056_v2 = vadd.f32 %v1032_v20, %v1008_v48  ;;  %v999_v57 = vadd.f32 %v1588_v41, %v903_v37  ;;  %v1000_v5 = vadd.f32 %v1588_v41, %v904_v46  ;;  %v1030_v41 = vld [vmem:[%s1935_s2 + $0x48] sm:$0xff]  ;;  %v1039_v48 = vld [vmem:[%s1935_s2 + $0x90] sm:$0xff]  ;;  %v1040_v37 = vld [vmem:[%s1935_s2 + $0x98] sm:$0xff] }
 0x277   :  { %1079 = vst [vmem:[#allocation7 + $0x50] sm:$0xff] %v1055_v47  ;;  %v1047_v10 = vadd.f32 %v1023_v14, %v999_v57  ;;  %v1048_v1 = vadd.f32 %v1024_v4, %v1000_v5  ;;  %v1041_v5 = vld [vmem:[%s1935_s2 + $0xa0] sm:$0xff] }
 0x278   :  { %1080 = vst.msk [vmem:[#allocation7 + $0x58] sm:$0xff] %vm516_vm1, %v1056_v2 }
 0x279   :  { %1071 = vst [vmem:[#allocation7 + $0x10] sm:$0xff] %v1047_v10  ;;  %v1042_v10 = vld [vmem:[%s1935_s2 + $0xa8] sm:$0xff] }
 0x27a   :  { %1072 = vst.msk [vmem:[#allocation7 + $0x18] sm:$0xff] %vm516_vm1, %v1048_v1 }
 0x27c   :  { %v864_v61 = vpop.permute.xlu1 %863 }
 0x27d   :  { %v909_v0 = vmul.f32 %v864_v61, %v1651_v30  ;;  %v910_v52 = vmul.f32 %v864_v61, %v1654_v31 }
 0x27f   :  { %v1005_v38 = vadd.f32 %v1593_v12, %v909_v0  ;;  %v1006_v18 = vadd.f32 %v1593_v12, %v910_v52 }
 0x281   :  { %v1053_v60 = vadd.f32 %v1029_v6, %v1005_v38  ;;  %v1054_v43 = vadd.f32 %v1030_v41, %v1006_v18 }
 0x283   :  { %1077 = vst [vmem:[#allocation7 + $0x40] sm:$0xff] %v1053_v60 }
 0x284   :  { %1078 = vst.msk [vmem:[#allocation7 + $0x48] sm:$0xff] %vm516_vm1, %v1054_v43  ;;  %v884_v30 = vpop.permute.xlu2 %883 }
 0x285   :  { %v917_v31 = vmul.f32 %v884_v30, %v1695_v32  ;;  %v918_v26 = vmul.f32 %v884_v30, %v1698_v53 }
 0x287   :  { %v1013_v12 = vadd.f32 %v1742_v50, %v917_v31  ;;  %v1014_v21 = vadd.f32 %v1742_v50, %v918_v26 }
 0x289   :  { %v1061_v15 = vadd.f32 %v1037_v33, %v1013_v12  ;;  %v1062_v35 = vadd.f32 %v1038_v24, %v1014_v21 }
 0x28b   :  { %1085 = vst [vmem:[#allocation7 + $0x80] sm:$0xff] %v1061_v15 }
 0x28c   :  { %1086 = vst.msk [vmem:[#allocation7 + $0x88] sm:$0xff] %vm516_vm1, %v1062_v35  ;;  %v874_v32 = vpop.permute.xlu1 %873 }
 0x28d   :  { %v913_v53 = vmul.f32 %v874_v32, %v1673_v59  ;;  %v914_v55 = vmul.f32 %v874_v32, %v1676_v8 }
 0x28f   :  { %v1009_v50 = vadd.f32 %v1740_v7, %v913_v53  ;;  %v1010_v42 = vadd.f32 %v1740_v7, %v914_v55 }
 0x291   :  { %v1057_v9 = vadd.f32 %v1033_v27, %v1009_v50  ;;  %v1058_v54 = vadd.f32 %v1034_v49, %v1010_v42 }
 0x293   :  { %1081 = vst [vmem:[#allocation7 + $0x60] sm:$0xff] %v1057_v9 }
 0x294   :  { %1082 = vst.msk [vmem:[#allocation7 + $0x68] sm:$0xff] %vm516_vm1, %v1058_v54  ;;  %v879_v59 = vpop.permute.xlu0 %878 }
 0x295   :  { %v915_v8 = vmul.f32 %v879_v59, %v1684_v17  ;;  %v916_v16 = vmul.f32 %v879_v59, %v1687_v13 }
 0x297   :  { %v1011_v7 = vadd.f32 %v1738_v23, %v915_v8  ;;  %v1012_v36 = vadd.f32 %v1738_v23, %v916_v16 }
 0x299   :  { %v1059_v39 = vadd.f32 %v1035_v56, %v1011_v7  ;;  %v1060_v44 = vadd.f32 %v1036_v22, %v1012_v36 }
 0x29b   :  { %1083 = vst [vmem:[#allocation7 + $0x70] sm:$0xff] %v1059_v39 }
 0x29c   :  { %1084 = vst.msk [vmem:[#allocation7 + $0x78] sm:$0xff] %vm516_vm1, %v1060_v44  ;;  %v899_v17 = vpop.permute.xlu2 %898 }
 0x29d   :  { %v923_v13 = vmul.f32 %v899_v17, %v1728_v45  ;;  %v924_v34 = vmul.f32 %v899_v17, %v1731_v3 }
 0x2a4   :  { %v889_v19 = vpop.permute.xlu1 %888  ;;  %v995_v23 = vpop.permute.xlu2 %994 }
 0x2a5   :  { %v1019_v25 = vadd.f32 %v995_v23, %v923_v13  ;;  %v1020_v20 = vadd.f32 %v995_v23, %v924_v34  ;;  %v919_v45 = vmul.f32 %v889_v19, %v1706_v29  ;;  %v920_v3 = vmul.f32 %v889_v19, %v1709_v58 }
 0x2a7   :  { %v1067_v40 = vadd.f32 %v1043_v28, %v1019_v25  ;;  %v1068_v62 = vadd.f32 %v1044_v51, %v1020_v20 }
 0x2a9   :  { %1091 = vst [vmem:[#allocation7 + $0xb0] sm:$0xff] %v1067_v40 }
 0x2aa   :  { %1092 = vst.msk [vmem:[#allocation7 + $0xb8] sm:$0xff] %vm516_vm1, %v1068_v62 }
 0x2ac   :  { %v985_v46 = vpop.permute.xlu1 %984  ;;  %v894_v14 = vpop.permute.xlu0 %893 }
 0x2ad   :  { %v1015_v4 = vadd.f32 %v985_v46, %v919_v45  ;;  %v1016_v47 = vadd.f32 %v985_v46, %v920_v3  ;;  %v921_v29 = vmul.f32 %v894_v14, %v1717_v11  ;;  %v922_v58 = vmul.f32 %v894_v14, %v1720_v63 }
 0x2af   :  { %v1063_v2 = vadd.f32 %v1039_v48, %v1015_v4  ;;  %v1064_v57 = vadd.f32 %v1040_v37, %v1016_v47 }
 0x2b1   :  { %1087 = vst [vmem:[#allocation7 + $0x90] sm:$0xff] %v1063_v2 }
 0x2b2   :  { %1088 = vst.msk [vmem:[#allocation7 + $0x98] sm:$0xff] %vm516_vm1, %v1064_v57 }
 0x2b4   :  { %v990_v1 = vpop.permute.xlu0 %989 }
 0x2b5   :  { %v1017_v61 = vadd.f32 %v990_v1, %v921_v29  ;;  %v1018_v0 = vadd.f32 %v990_v1, %v922_v58 }
 0x2b7   :  { %v1065_v11 = vadd.f32 %v1041_v5, %v1017_v61  ;;  %v1066_v52 = vadd.f32 %v1042_v10, %v1018_v0 }
 0x2b9   :  { %1089 = vst [vmem:[#allocation7 + $0xa0] sm:$0xff] %v1065_v11 }
 0x2ba   :  { %1090 = vst.msk [vmem:[#allocation7 + $0xa8] sm:$0xff] %vm516_vm1, %v1066_v52 }
 0x2bb   :  { %1105 = dma.vmem_to_hbm [thread:$0]  %s1098_s23, 3072, %s1100_s26, [#allocation4], %s1278_s30, %s1278_s30, %s1279_s6  }
 0x2bc   :  { %1272 = dma.done.wait [#allocation4], 3072  }
 0x2bd   :  { %1273 = vsyncadd [#allocation4], 4294964224 }
 0x2be   :  { %1110 = vsyncpa [#allocation3], 1 }
 0x2bf   :  { %1111 = vsyncpa [#allocation6], 1 }
 0x2c0   :  { %1112 = vsyncpa [#allocation4], 1 }

</bundles_post_ra>
